<compile_context>
chip_gen: v7x
topology: tpu7x:2x2x1
jax: 0.10.0
libtpu: 0.0.40
codegen_flags: <defaults>
</compile_context>

<pallas_src>
import math
from functools import partial

import jax
import jax.numpy as jnp
from jax import lax
from jax.experimental import pallas as pl
from jax.experimental.pallas import tpu as pltpu


# ------------------------------ fused kernel ------------------------------

def _cross_attention_kernel(x_ref, enc_ref,
                            wq_ref, bq_ref, wk_ref, bk_ref, wv_ref, bv_ref,
                            wp_ref, bp_ref,
                            o_ref, *, n_head, scale):
    # x_ref:   (1, tq, C) decoder-side activations for this (batch, q-tile)
    # enc_ref: (1, S,  C) encoder activations for this batch element
    x = x_ref[0]        # (tq, C)
    enc = enc_ref[0]    # (S, C)

    # Fused Q/K/V projections; results stay in VMEM/vregs.
    q = jnp.dot(x, wq_ref[...], preferred_element_type=jnp.float32) + bq_ref[...]
    k = jnp.dot(enc, wk_ref[...], preferred_element_type=jnp.float32) + bk_ref[...]
    v = jnp.dot(enc, wv_ref[...], preferred_element_type=jnp.float32) + bv_ref[...]

    tq, C = q.shape
    dh = C // n_head

    # Per-head attention; head split/merge done entirely inside the kernel
    # (static lane slices, unrolled at trace time).
    y_parts = []
    for h in range(n_head):
        sl = slice(h * dh, (h + 1) * dh)
        qh = q[:, sl]           # (tq, dh)
        kh = k[:, sl]           # (S,  dh)
        vh = v[:, sl]           # (S,  dh)
        # Contract the last axis of both q and k -> no explicit k.T transpose.
        s = lax.dot_general(qh, kh, (((1,), (1,)), ((), ())),
                            preferred_element_type=jnp.float32) * scale  # (tq, S)
        m = jnp.max(s, axis=-1, keepdims=True)
        p = jnp.exp(s - m)
        denom = jnp.sum(p, axis=-1, keepdims=True)
        p = p * pl.reciprocal(denom, approx=True)        # EUP, nearly free
        y_parts.append(jnp.dot(p, vh, preferred_element_type=jnp.float32))

    y = jnp.concatenate(y_parts, axis=-1)                # (tq, C) merged heads

    out = jnp.dot(y, wp_ref[...], preferred_element_type=jnp.float32) + bp_ref[...]
    o_ref[0] = out.astype(o_ref.dtype)


def cross_attention(params, x, encoder_output, n_head):
    """x: (B, T, C) f32, encoder_output: (B, S, C) f32 -> (B, T, C) f32."""
    B, T, C = x.shape
    S = encoder_output.shape[1]
    assert C % n_head == 0
    scale = 1.0 / math.sqrt(C // n_head)

    # Query-row tile: whole T for small sequences, 128-row tiles otherwise.
    tq = T if T <= 128 else 128
    assert T % tq == 0, "T must be a multiple of the query tile"
    grid = (B, T // tq)

    wq, bq = params["q_w"], params["q_b"].reshape(1, C)
    wk, bk = params["k_w"], params["k_b"].reshape(1, C)
    wv, bv = params["v_w"], params["v_b"].reshape(1, C)
    wp, bp = params["proj_w"], params["proj_b"].reshape(1, C)

    # Weights/biases: constant block index across the grid -> stay resident.
    w_spec = pl.BlockSpec((C, C), lambda b, t: (0, 0))
    b_spec = pl.BlockSpec((1, C), lambda b, t: (0, 0))

    return pl.pallas_call(
        partial(_cross_attention_kernel, n_head=n_head, scale=scale),
        out_shape=jax.ShapeDtypeStruct((B, T, C), jnp.float32),
        grid=grid,
        in_specs=[
            pl.BlockSpec((1, tq, C), lambda b, t: (b, t, 0)),   # x (q tile)
            pl.BlockSpec((1, S, C), lambda b, t: (b, 0, 0)),    # encoder_output
            w_spec, b_spec,     # query
            w_spec, b_spec,     # key
            w_spec, b_spec,     # value
            w_spec, b_spec,     # c_proj
        ],
        out_specs=pl.BlockSpec((1, tq, C), lambda b, t: (b, t, 0)),
        compiler_params=pltpu.CompilerParams(
            dimension_semantics=("parallel", "parallel")),
    )(x, encoder_output, wq, bq, wk, bk, wv, bv, wp, bp)


# --------------------------- pure-JAX reference ----------------------------

def cross_attention_ref(params, x, enc, n_head):
    B, T, C = x.shape
    S = enc.shape[1]
    dh = C // n_head
    q = x @ params["q_w"] + params["q_b"]
    k = enc @ params["k_w"] + params["k_b"]
    v = enc @ params["v_w"] + params["v_b"]
    q = q.reshape(B, T, n_head, dh).transpose(0, 2, 1, 3)
    k = k.reshape(B, S, n_head, dh).transpose(0, 2, 1, 3)
    v = v.reshape(B, S, n_head, dh).transpose(0, 2, 1, 3)
    att = jnp.einsum("bhtd,bhsd->bhts", q, k) * (1.0 / math.sqrt(dh))
    att = jax.nn.softmax(att, axis=-1)
    y = jnp.einsum("bhts,bhsd->bhtd", att, v)
    y = y.transpose(0, 2, 1, 3).reshape(B, T, C)
    return y @ params["proj_w"] + params["proj_b"]


# ---------------------------------- main -----------------------------------

if __name__ == "__main__":
    class Cfg:
        n_embd = 32
        n_head = 4

    cfg = Cfg()
    C = cfg.n_embd

    key = jax.random.PRNGKey(0)
    keys = jax.random.split(key, 10)

    def w(k):
        return (0.02 * jax.random.normal(k, (C, C))).astype(jnp.float32)

    def b(k):
        return (0.02 * jax.random.normal(k, (C,))).astype(jnp.float32)

    params = {
        "q_w": w(keys[0]), "q_b": b(keys[1]),
        "k_w": w(keys[2]), "k_b": b(keys[3]),
        "v_w": w(keys[4]), "v_b": b(keys[5]),
        "proj_w": w(keys[6]), "proj_b": b(keys[7]),
    }

    B, T, S = 2, 8, 8
    x = jax.random.normal(keys[8], (B, T, C), dtype=jnp.float32)
    encoder_output = jax.random.normal(keys[9], (B, S, C), dtype=jnp.float32)

    out = cross_attention(params, x, encoder_output, cfg.n_head)
    out = jax.block_until_ready(out)

    assert out.shape == (B, T, C)
    assert bool(jnp.all(jnp.isfinite(out)))

    ref = cross_attention_ref(params, x, encoder_output, cfg.n_head)
    max_err = float(jnp.max(jnp.abs(out - ref)))
    assert max_err < 1e-2, f"max abs err {max_err}"

    print("KERNEL_OK")
</pallas_src>

<mosaic_0001>
module attributes {stable_mosaic.version = 11 : i64} {
  func.func @_cross_attention_kernel(%arg0: i32, %arg1: i32, %arg2: memref<1x8x32xf32, #tpu.memory_space<vmem>>, %arg3: memref<1x8x32xf32, #tpu.memory_space<vmem>>, %arg4: memref<32x32xf32, #tpu.memory_space<vmem>>, %arg5: memref<1x32xf32, #tpu.memory_space<vmem>>, %arg6: memref<32x32xf32, #tpu.memory_space<vmem>>, %arg7: memref<1x32xf32, #tpu.memory_space<vmem>>, %arg8: memref<32x32xf32, #tpu.memory_space<vmem>>, %arg9: memref<1x32xf32, #tpu.memory_space<vmem>>, %arg10: memref<32x32xf32, #tpu.memory_space<vmem>>, %arg11: memref<1x32xf32, #tpu.memory_space<vmem>>, %arg12: memref<1x8x32xf32, #tpu.memory_space<vmem>>) attributes {dimension_semantics = [#tpu.dimension_semantics<parallel>, #tpu.dimension_semantics<parallel>], iteration_bounds = array<i64: 2, 1>, scalar_prefetch = 0 : i64, scratch_operands = 0 : i64, tpu.core_type = #tpu.core_type<tc>, window_params = [{transform_indices = @transform_0, window_bounds = array<i64: 1, 8, 32>}, {transform_indices = @transform_1, window_bounds = array<i64: 1, 8, 32>}, {pipeline_mode = #tpu.pipeline_mode<synchronous>, transform_indices = @transform_2, window_bounds = array<i64: 32, 32>}, {pipeline_mode = #tpu.pipeline_mode<synchronous>, transform_indices = @transform_3, window_bounds = array<i64: 1, 32>}, {pipeline_mode = #tpu.pipeline_mode<synchronous>, transform_indices = @transform_4, window_bounds = array<i64: 32, 32>}, {pipeline_mode = #tpu.pipeline_mode<synchronous>, transform_indices = @transform_5, window_bounds = array<i64: 1, 32>}, {pipeline_mode = #tpu.pipeline_mode<synchronous>, transform_indices = @transform_6, window_bounds = array<i64: 32, 32>}, {pipeline_mode = #tpu.pipeline_mode<synchronous>, transform_indices = @transform_7, window_bounds = array<i64: 1, 32>}, {pipeline_mode = #tpu.pipeline_mode<synchronous>, transform_indices = @transform_8, window_bounds = array<i64: 32, 32>}, {pipeline_mode = #tpu.pipeline_mode<synchronous>, transform_indices = @transform_9, window_bounds = array<i64: 1, 32>}, {transform_indices = @transform_10, window_bounds = array<i64: 1, 8, 32>}]} {
    %c0 = arith.constant 0 : index
    %c0_0 = arith.constant 0 : index
    %c0_1 = arith.constant 0 : index
    %0 = vector.load %arg2[%c0, %c0_0, %c0_1] : memref<1x8x32xf32, #tpu.memory_space<vmem>>, vector<1x8x32xf32>
    %1 = vector.shape_cast %0 : vector<1x8x32xf32> to vector<8x32xf32>
    %c0_2 = arith.constant 0 : index
    %c0_3 = arith.constant 0 : index
    %c0_4 = arith.constant 0 : index
    %2 = vector.load %arg3[%c0_2, %c0_3, %c0_4] : memref<1x8x32xf32, #tpu.memory_space<vmem>>, vector<1x8x32xf32>
    %3 = vector.shape_cast %2 : vector<1x8x32xf32> to vector<8x32xf32>
    %c0_5 = arith.constant 0 : index
    %c0_6 = arith.constant 0 : index
    %4 = vector.load %arg4[%c0_5, %c0_6] : memref<32x32xf32, #tpu.memory_space<vmem>>, vector<32x32xf32>
    %cst = arith.constant dense<0.000000e+00> : vector<8x32xf32>
    %5 = tpu.matmul %1, %4, %cst {dimension_numbers = #tpu.dot_dimension_numbers<[1], [0], [0], [1], [0, 0, 1, 1], [], []>} : vector<8x32xf32>, vector<32x32xf32>, vector<8x32xf32> -> vector<8x32xf32>
    %c0_7 = arith.constant 0 : index
    %c0_8 = arith.constant 0 : index
    %6 = vector.load %arg5[%c0_7, %c0_8] : memref<1x32xf32, #tpu.memory_space<vmem>>, vector<1x32xf32>
    %7 = vector.broadcast %6 : vector<1x32xf32> to vector<8x32xf32>
    %8 = arith.addf %5, %7 : vector<8x32xf32>
    %c0_9 = arith.constant 0 : index
    %c0_10 = arith.constant 0 : index
    %9 = vector.load %arg6[%c0_9, %c0_10] : memref<32x32xf32, #tpu.memory_space<vmem>>, vector<32x32xf32>
    %cst_11 = arith.constant dense<0.000000e+00> : vector<8x32xf32>
    %10 = tpu.matmul %3, %9, %cst_11 {dimension_numbers = #tpu.dot_dimension_numbers<[1], [0], [0], [1], [0, 0, 1, 1], [], []>} : vector<8x32xf32>, vector<32x32xf32>, vector<8x32xf32> -> vector<8x32xf32>
    %c0_12 = arith.constant 0 : index
    %c0_13 = arith.constant 0 : index
    %11 = vector.load %arg7[%c0_12, %c0_13] : memref<1x32xf32, #tpu.memory_space<vmem>>, vector<1x32xf32>
    %12 = vector.broadcast %11 : vector<1x32xf32> to vector<8x32xf32>
    %13 = arith.addf %10, %12 : vector<8x32xf32>
    %c0_14 = arith.constant 0 : index
    %c0_15 = arith.constant 0 : index
    %14 = vector.load %arg8[%c0_14, %c0_15] : memref<32x32xf32, #tpu.memory_space<vmem>>, vector<32x32xf32>
    %cst_16 = arith.constant dense<0.000000e+00> : vector<8x32xf32>
    %15 = tpu.matmul %3, %14, %cst_16 {dimension_numbers = #tpu.dot_dimension_numbers<[1], [0], [0], [1], [0, 0, 1, 1], [], []>} : vector<8x32xf32>, vector<32x32xf32>, vector<8x32xf32> -> vector<8x32xf32>
    %c0_17 = arith.constant 0 : index
    %c0_18 = arith.constant 0 : index
    %16 = vector.load %arg9[%c0_17, %c0_18] : memref<1x32xf32, #tpu.memory_space<vmem>>, vector<1x32xf32>
    %17 = vector.broadcast %16 : vector<1x32xf32> to vector<8x32xf32>
    %18 = arith.addf %15, %17 : vector<8x32xf32>
    %19 = vector.extract_strided_slice %8 {offsets = [0, 0], sizes = [8, 8], strides = [1, 1]} : vector<8x32xf32> to vector<8x8xf32>
    %20 = vector.extract_strided_slice %13 {offsets = [0, 0], sizes = [8, 8], strides = [1, 1]} : vector<8x32xf32> to vector<8x8xf32>
    %21 = vector.extract_strided_slice %18 {offsets = [0, 0], sizes = [8, 8], strides = [1, 1]} : vector<8x32xf32> to vector<8x8xf32>
    %cst_19 = arith.constant dense<0.000000e+00> : vector<8x8xf32>
    %22 = tpu.matmul %19, %20, %cst_19 {dimension_numbers = #tpu.dot_dimension_numbers<[1], [1], [0], [0], [0, 0, 1, 0], [], []>} : vector<8x8xf32>, vector<8x8xf32>, vector<8x8xf32> -> vector<8x8xf32>
    %cst_20 = arith.constant 0.353553385 : f32
    %23 = vector.broadcast %cst_20 : f32 to vector<8x8xf32>
    %24 = arith.mulf %22, %23 : vector<8x8xf32>
    %cst_21 = arith.constant dense<0xFF800000> : vector<8xf32>
    %25 = vector.multi_reduction <maximumf>, %24, %cst_21 [1] : vector<8x8xf32> to vector<8xf32>
    %26 = vector.shape_cast %25 : vector<8xf32> to vector<8x1xf32>
    %27 = vector.broadcast %26 : vector<8x1xf32> to vector<8x8xf32>
    %28 = arith.subf %24, %27 : vector<8x8xf32>
    %29 = math.exp %28 : vector<8x8xf32>
    %cst_22 = arith.constant dense<0.000000e+00> : vector<8xf32>
    %30 = vector.multi_reduction <add>, %29, %cst_22 [1] : vector<8x8xf32> to vector<8xf32>
    %31 = vector.shape_cast %30 : vector<8xf32> to vector<8x1xf32>
    %32 = tpu.reciprocal %31 {approx = true} : vector<8x1xf32> -> vector<8x1xf32>
    %33 = vector.broadcast %32 : vector<8x1xf32> to vector<8x8xf32>
    %34 = arith.mulf %29, %33 : vector<8x8xf32>
    %cst_23 = arith.constant dense<0.000000e+00> : vector<8x8xf32>
    %35 = tpu.matmul %34, %21, %cst_23 {dimension_numbers = #tpu.dot_dimension_numbers<[1], [0], [0], [1], [0, 0, 1, 1], [], []>} : vector<8x8xf32>, vector<8x8xf32>, vector<8x8xf32> -> vector<8x8xf32>
    %36 = vector.extract_strided_slice %8 {offsets = [0, 8], sizes = [8, 8], strides = [1, 1]} : vector<8x32xf32> to vector<8x8xf32>
    %37 = vector.extract_strided_slice %13 {offsets = [0, 8], sizes = [8, 8], strides = [1, 1]} : vector<8x32xf32> to vector<8x8xf32>
    %38 = vector.extract_strided_slice %18 {offsets = [0, 8], sizes = [8, 8], strides = [1, 1]} : vector<8x32xf32> to vector<8x8xf32>
    %cst_24 = arith.constant dense<0.000000e+00> : vector<8x8xf32>
    %39 = tpu.matmul %36, %37, %cst_24 {dimension_numbers = #tpu.dot_dimension_numbers<[1], [1], [0], [0], [0, 0, 1, 0], [], []>} : vector<8x8xf32>, vector<8x8xf32>, vector<8x8xf32> -> vector<8x8xf32>
    %cst_25 = arith.constant 0.353553385 : f32
    %40 = vector.broadcast %cst_25 : f32 to vector<8x8xf32>
    %41 = arith.mulf %39, %40 : vector<8x8xf32>
    %cst_26 = arith.constant dense<0xFF800000> : vector<8xf32>
    %42 = vector.multi_reduction <maximumf>, %41, %cst_26 [1] : vector<8x8xf32> to vector<8xf32>
    %43 = vector.shape_cast %42 : vector<8xf32> to vector<8x1xf32>
    %44 = vector.broadcast %43 : vector<8x1xf32> to vector<8x8xf32>
    %45 = arith.subf %41, %44 : vector<8x8xf32>
    %46 = math.exp %45 : vector<8x8xf32>
    %cst_27 = arith.constant dense<0.000000e+00> : vector<8xf32>
    %47 = vector.multi_reduction <add>, %46, %cst_27 [1] : vector<8x8xf32> to vector<8xf32>
    %48 = vector.shape_cast %47 : vector<8xf32> to vector<8x1xf32>
    %49 = tpu.reciprocal %48 {approx = true} : vector<8x1xf32> -> vector<8x1xf32>
    %50 = vector.broadcast %49 : vector<8x1xf32> to vector<8x8xf32>
    %51 = arith.mulf %46, %50 : vector<8x8xf32>
    %cst_28 = arith.constant dense<0.000000e+00> : vector<8x8xf32>
    %52 = tpu.matmul %51, %38, %cst_28 {dimension_numbers = #tpu.dot_dimension_numbers<[1], [0], [0], [1], [0, 0, 1, 1], [], []>} : vector<8x8xf32>, vector<8x8xf32>, vector<8x8xf32> -> vector<8x8xf32>
    %53 = vector.extract_strided_slice %8 {offsets = [0, 16], sizes = [8, 8], strides = [1, 1]} : vector<8x32xf32> to vector<8x8xf32>
    %54 = vector.extract_strided_slice %13 {offsets = [0, 16], sizes = [8, 8], strides = [1, 1]} : vector<8x32xf32> to vector<8x8xf32>
    %55 = vector.extract_strided_slice %18 {offsets = [0, 16], sizes = [8, 8], strides = [1, 1]} : vector<8x32xf32> to vector<8x8xf32>
    %cst_29 = arith.constant dense<0.000000e+00> : vector<8x8xf32>
    %56 = tpu.matmul %53, %54, %cst_29 {dimension_numbers = #tpu.dot_dimension_numbers<[1], [1], [0], [0], [0, 0, 1, 0], [], []>} : vector<8x8xf32>, vector<8x8xf32>, vector<8x8xf32> -> vector<8x8xf32>
    %cst_30 = arith.constant 0.353553385 : f32
    %57 = vector.broadcast %cst_30 : f32 to vector<8x8xf32>
    %58 = arith.mulf %56, %57 : vector<8x8xf32>
    %cst_31 = arith.constant dense<0xFF800000> : vector<8xf32>
    %59 = vector.multi_reduction <maximumf>, %58, %cst_31 [1] : vector<8x8xf32> to vector<8xf32>
    %60 = vector.shape_cast %59 : vector<8xf32> to vector<8x1xf32>
    %61 = vector.broadcast %60 : vector<8x1xf32> to vector<8x8xf32>
    %62 = arith.subf %58, %61 : vector<8x8xf32>
    %63 = math.exp %62 : vector<8x8xf32>
    %cst_32 = arith.constant dense<0.000000e+00> : vector<8xf32>
    %64 = vector.multi_reduction <add>, %63, %cst_32 [1] : vector<8x8xf32> to vector<8xf32>
    %65 = vector.shape_cast %64 : vector<8xf32> to vector<8x1xf32>
    %66 = tpu.reciprocal %65 {approx = true} : vector<8x1xf32> -> vector<8x1xf32>
    %67 = vector.broadcast %66 : vector<8x1xf32> to vector<8x8xf32>
    %68 = arith.mulf %63, %67 : vector<8x8xf32>
    %cst_33 = arith.constant dense<0.000000e+00> : vector<8x8xf32>
    %69 = tpu.matmul %68, %55, %cst_33 {dimension_numbers = #tpu.dot_dimension_numbers<[1], [0], [0], [1], [0, 0, 1, 1], [], []>} : vector<8x8xf32>, vector<8x8xf32>, vector<8x8xf32> -> vector<8x8xf32>
    %70 = vector.extract_strided_slice %8 {offsets = [0, 24], sizes = [8, 8], strides = [1, 1]} : vector<8x32xf32> to vector<8x8xf32>
    %71 = vector.extract_strided_slice %13 {offsets = [0, 24], sizes = [8, 8], strides = [1, 1]} : vector<8x32xf32> to vector<8x8xf32>
    %72 = vector.extract_strided_slice %18 {offsets = [0, 24], sizes = [8, 8], strides = [1, 1]} : vector<8x32xf32> to vector<8x8xf32>
    %cst_34 = arith.constant dense<0.000000e+00> : vector<8x8xf32>
    %73 = tpu.matmul %70, %71, %cst_34 {dimension_numbers = #tpu.dot_dimension_numbers<[1], [1], [0], [0], [0, 0, 1, 0], [], []>} : vector<8x8xf32>, vector<8x8xf32>, vector<8x8xf32> -> vector<8x8xf32>
    %cst_35 = arith.constant 0.353553385 : f32
    %74 = vector.broadcast %cst_35 : f32 to vector<8x8xf32>
    %75 = arith.mulf %73, %74 : vector<8x8xf32>
    %cst_36 = arith.constant dense<0xFF800000> : vector<8xf32>
    %76 = vector.multi_reduction <maximumf>, %75, %cst_36 [1] : vector<8x8xf32> to vector<8xf32>
    %77 = vector.shape_cast %76 : vector<8xf32> to vector<8x1xf32>
    %78 = vector.broadcast %77 : vector<8x1xf32> to vector<8x8xf32>
    %79 = arith.subf %75, %78 : vector<8x8xf32>
    %80 = math.exp %79 : vector<8x8xf32>
    %cst_37 = arith.constant dense<0.000000e+00> : vector<8xf32>
    %81 = vector.multi_reduction <add>, %80, %cst_37 [1] : vector<8x8xf32> to vector<8xf32>
    %82 = vector.shape_cast %81 : vector<8xf32> to vector<8x1xf32>
    %83 = tpu.reciprocal %82 {approx = true} : vector<8x1xf32> -> vector<8x1xf32>
    %84 = vector.broadcast %83 : vector<8x1xf32> to vector<8x8xf32>
    %85 = arith.mulf %80, %84 : vector<8x8xf32>
    %cst_38 = arith.constant dense<0.000000e+00> : vector<8x8xf32>
    %86 = tpu.matmul %85, %72, %cst_38 {dimension_numbers = #tpu.dot_dimension_numbers<[1], [0], [0], [1], [0, 0, 1, 1], [], []>} : vector<8x8xf32>, vector<8x8xf32>, vector<8x8xf32> -> vector<8x8xf32>
    %87 = tpu.concatenate %35, %52, %69, %86 in 1 : vector<8x8xf32>, vector<8x8xf32>, vector<8x8xf32>, vector<8x8xf32> -> vector<8x32xf32>
    %c0_39 = arith.constant 0 : index
    %c0_40 = arith.constant 0 : index
    %88 = vector.load %arg10[%c0_39, %c0_40] : memref<32x32xf32, #tpu.memory_space<vmem>>, vector<32x32xf32>
    %cst_41 = arith.constant dense<0.000000e+00> : vector<8x32xf32>
    %89 = tpu.matmul %87, %88, %cst_41 {dimension_numbers = #tpu.dot_dimension_numbers<[1], [0], [0], [1], [0, 0, 1, 1], [], []>} : vector<8x32xf32>, vector<32x32xf32>, vector<8x32xf32> -> vector<8x32xf32>
    %c0_42 = arith.constant 0 : index
    %c0_43 = arith.constant 0 : index
    %90 = vector.load %arg11[%c0_42, %c0_43] : memref<1x32xf32, #tpu.memory_space<vmem>>, vector<1x32xf32>
    %91 = vector.broadcast %90 : vector<1x32xf32> to vector<8x32xf32>
    %92 = arith.addf %89, %91 : vector<8x32xf32>
    %c0_44 = arith.constant 0 : index
    %c0_45 = arith.constant 0 : index
    %c0_46 = arith.constant 0 : index
    %93 = vector.load %arg12[%c0_44, %c0_45, %c0_46] : memref<1x8x32xf32, #tpu.memory_space<vmem>>, vector<1x8x32xf32>
    %94 = vector.shape_cast %93 : vector<1x8x32xf32> to vector<8x32xf32>
    %95 = vector.shape_cast %92 : vector<8x32xf32> to vector<1x8x32xf32>
    tpu.vector_store %arg12[%c0_44, %c0_45, %c0_46], %95 {strides = array<i32>} : memref<1x8x32xf32, #tpu.memory_space<vmem>>, vector<1x8x32xf32>,
    return
  }
  func.func @transform_0(%arg0: i32, %arg1: i32) -> (i32, i32, i32) {
    %c0_i32 = arith.constant 0 : i32
    %c0_i32_0 = arith.constant 0 : i32
    return %arg0, %arg1, %c0_i32 : i32, i32, i32
  }
  func.func @transform_1(%arg0: i32, %arg1: i32) -> (i32, i32, i32) {
    %c0_i32 = arith.constant 0 : i32
    %c0_i32_0 = arith.constant 0 : i32
    %c0_i32_1 = arith.constant 0 : i32
    return %arg0, %c0_i32, %c0_i32_0 : i32, i32, i32
  }
  func.func @transform_2(%arg0: i32, %arg1: i32) -> (i32, i32) {
    %c0_i32 = arith.constant 0 : i32
    %c0_i32_0 = arith.constant 0 : i32
    %c0_i32_1 = arith.constant 0 : i32
    return %c0_i32, %c0_i32_0 : i32, i32
  }
  func.func @transform_3(%arg0: i32, %arg1: i32) -> (i32, i32) {
    %c0_i32 = arith.constant 0 : i32
    %c0_i32_0 = arith.constant 0 : i32
    %c0_i32_1 = arith.constant 0 : i32
    return %c0_i32, %c0_i32_0 : i32, i32
  }
  func.func @transform_4(%arg0: i32, %arg1: i32) -> (i32, i32) {
    %c0_i32 = arith.constant 0 : i32
    %c0_i32_0 = arith.constant 0 : i32
    %c0_i32_1 = arith.constant 0 : i32
    return %c0_i32, %c0_i32_0 : i32, i32
  }
  func.func @transform_5(%arg0: i32, %arg1: i32) -> (i32, i32) {
    %c0_i32 = arith.constant 0 : i32
    %c0_i32_0 = arith.constant 0 : i32
    %c0_i32_1 = arith.constant 0 : i32
    return %c0_i32, %c0_i32_0 : i32, i32
  }
  func.func @transform_6(%arg0: i32, %arg1: i32) -> (i32, i32) {
    %c0_i32 = arith.constant 0 : i32
    %c0_i32_0 = arith.constant 0 : i32
    %c0_i32_1 = arith.constant 0 : i32
    return %c0_i32, %c0_i32_0 : i32, i32
  }
  func.func @transform_7(%arg0: i32, %arg1: i32) -> (i32, i32) {
    %c0_i32 = arith.constant 0 : i32
    %c0_i32_0 = arith.constant 0 : i32
    %c0_i32_1 = arith.constant 0 : i32
    return %c0_i32, %c0_i32_0 : i32, i32
  }
  func.func @transform_8(%arg0: i32, %arg1: i32) -> (i32, i32) {
    %c0_i32 = arith.constant 0 : i32
    %c0_i32_0 = arith.constant 0 : i32
    %c0_i32_1 = arith.constant 0 : i32
    return %c0_i32, %c0_i32_0 : i32, i32
  }
  func.func @transform_9(%arg0: i32, %arg1: i32) -> (i32, i32) {
    %c0_i32 = arith.constant 0 : i32
    %c0_i32_0 = arith.constant 0 : i32
    %c0_i32_1 = arith.constant 0 : i32
    return %c0_i32, %c0_i32_0 : i32, i32
  }
  func.func @transform_10(%arg0: i32, %arg1: i32) -> (i32, i32, i32) {
    %c0_i32 = arith.constant 0 : i32
    %c0_i32_0 = arith.constant 0 : i32
    return %arg0, %arg1, %c0_i32 : i32, i32, i32
  }
}

</mosaic_0001>

<bundles_post_ra>
// kernel: tpu_custom_call.1
= control target key start
LH: loop header
LB: loop body
LE: loop exit
PB: predicated region body
PF: predicated region fallthrough
CT: control target
= control target key end

     0   :  { %s2772_s0 = inlined_call_operand.hbm [shape: f32[2,8,32], index: 0, kind: input, shape index: {}]   ;;  %s2773_s1 = inlined_call_operand.hbm [shape: f32[2,8,32], index: 1, kind: input, shape index: {}]   ;;  %s2774_s2 = inlined_call_operand.hbm [shape: f32[32,32], index: 2, kind: input, shape index: {}]   ;;  %s2775_s3 = inlined_call_operand.vmem [shape: f32[1,32], index: 3, kind: input, shape index: {}]   ;;  %s2776_s4 = inlined_call_operand.hbm [shape: f32[32,32], index: 4, kind: input, shape index: {}]   ;;  %s2777_s5 = inlined_call_operand.vmem [shape: f32[1,32], index: 5, kind: input, shape index: {}]   ;;  %s2778_s6 = inlined_call_operand.hbm [shape: f32[32,32], index: 6, kind: input, shape index: {}]   ;;  %s2779_s7 = inlined_call_operand.vmem [shape: f32[1,32], index: 7, kind: input, shape index: {}]   ;;  %s2780_s8 = inlined_call_operand.hbm [shape: f32[32,32], index: 8, kind: input, shape index: {}]   ;;  %s2781_s9 = inlined_call_operand.vmem [shape: f32[1,32], index: 9, kind: input, shape index: {}]   ;;  %s2782_s10 = inlined_call_operand.hbm [shape: f32[2,8,32], index: 10, kind: output, shape index: {}]  }
   0x1   :  { %2789 = sst [smem:[#allocation22_spill]] %s2774_s2 }
   0x2   :  { %2790 = sst [smem:[#allocation23_spill]] %s2776_s4 }
   0x3   :  { %2791 = sst [smem:[#allocation24_spill]] %s2778_s6 }
   0x4   :  { %2792 = sst [smem:[#allocation25_spill]] %s2779_s7 }
   0x5   :  { %2793 = sst [smem:[#allocation26_spill]] %s2780_s8 }
   0x6   :  { %2794 = sst [smem:[#allocation27_spill]] %s2781_s9 }
   0x7   :  { %2795 = sst [smem:[#allocation28_spill]] %s2782_s10 }
   0x8   :  { %15 = vsyncpa [#allocation3], 0 }
   0x9   :  { %17 = vsyncpa [#allocation3 + $0x1], 0 }
   0xa   :  { %18 = vsyncpa [#allocation6], 0 }
   0xb   :  { %20 = vsyncpa [#allocation6 + $0x1], 0 }
   0xc   :  { %21 = vsyncpa [#allocation9], 0 }
   0xd   :  { %22 = vsyncpa [#allocation12], 0 }
   0xe   :  { %23 = vsyncpa [#allocation4], 0 }
   0xf   :  { %25 = vsyncpa [#allocation4 + $0x1], 0  ;;  %s2326_s13 = smov 0   ;;  %s2328_s14 = smov 0  }
  0x10   :  { %s2330_s15 = smov 0   ;;  %s2332_s16 = smov 0  }
  0x11   :  { %s2334_s17 = smov 0   ;;  %s2336_s18 = smov 0  }
  0x12 LB: > { %2796 = sst [smem:[#allocation20_spill]] %s2243_s16  ;;  %s2357_s19 = sadd.s32 4294967295, %s2251_s18   ;;  %s2251_s18 = sphi %s2336_s18, %s31_s18   ;;  %s2247_s17 = sphi %s2334_s17, %s2831_s17   ;;  %s2243_s16 = sphi %s2332_s16, %s2830_s16   ;;  %s2239_s15 = sphi %s2330_s15, %s2829_s15   ;;  %s2235_s14 = sphi %s2328_s14, %s2828_s14   ;;  %s2231_s13 = sphi %s2326_s13, %s2827_s13  }
  0x13   : > { %p1660_p0 = scmp.ge.s32.totalorder %s2251_s18, 1  ;;  %p2784_p1 = scmp.eq.s32.totalorder %s2357_s19, 0 }
  0x14   : > { %p298_p2 = scmp.lt.s32.totalorder %s2251_s18, 3  ;;  %s2253_s21 = smov [#allocation7]  }
  0x15   : > { %s310_s22 = sshll.u32 %s2253_s21, 4  ;;  %s2254_s24 = smov [#allocation8]   ;;  %s2366_s22 = int_to_ptr.vmem [resolvable:$true] %s310_s22 }
  0x16   : > { %p2362_p3 = pnand %p1660_p0, %p298_p2  ;;  %s326_s25 = sshll.u32 %s2254_s24, 4  ;;  %s2377_s25 = int_to_ptr.vmem [resolvable:$true] %s326_s25 }
  0x17   : > { %s2255_s26 = smov [#allocation10]   ;;  %s2799_s2 = sld [smem:[#allocation22_spill]] }
  0x18   : > { %s2797_s20 = scalar_select %p2362_p3, 1, 0 }
  0x19   : > { %p1868_p4 = pneg %p2362_p3  ;;  %s2379_s27 = sshll.u32 %s2255_s26, 4  ;;  %s343_s27 = int_to_ptr.vmem [resolvable:$true] %s2379_s27 }
  0x1b   : > { %p2373_p6 = pnand %p1868_p4, %p2784_p1 }
  0x1d   : > { %s1981_s30 = scalar_lea.hbm %s2799_s2, 512  ;;  %p2389_p8 = pneg %p2373_p6 }
  0x1e   : > { %p1982_p7 = scmp.ne.s32.totalorder %s2799_s2, %s1981_s30  ;;  %p1988_p11 = scmp.lt.u32.totalorder %s1981_s30, %s2799_s2 }
  0x20   : > { %p1984_p9 = pnand %p2389_p8, %p1982_p7 }
  0x22   : > { %p1985_p10 = pneg %p1984_p9 }
  0x24   : > { %p1990_p12 = pnand %p1988_p11, %p1985_p10 }
  0x26   : > { %1993 = shalt.err (!%p1990_p12)
}
  0x27   : > { %s1994_s28 = scalar_lea.vmem %s2366_s22, 512  ;;  %p2002_p4 = scmp.lt.s32.totalorder %s2366_s22, %s2366_s22 }
  0x28   : > { %p1995_p13 = scmp.ne.s32.totalorder %s2366_s22, %s1994_s28  ;;  %p2003_p5 = scmp.lt.s32.totalorder %s1994_s28, %s1994_s28 }
  0x2a   : > { %p1997_p0 = pnand %p1995_p13, %p2389_p8  ;;  %p2004_p7 = por %p2003_p5, %p2002_p4 }
  0x2c   : > { %p1998_p2 = pneg %p1997_p0 }
  0x2e   : > { %p2005_p9 = pnand %p2004_p7, %p1998_p2 }
  0x30   : > { %2008 = shalt.err (!%p2005_p9)
}
  0x31   : > { %s2256_s29 = smov 128   ;;  %s2257_s30 = smov 8  }
  0x32   : > { %1871 = dma.hbm_to_vmem [thread:$0]  (!%p2373_p6), %s2799_s2, 512, %s2366_s22, [#allocation6], %s2256_s29, %s2256_s29, %s2257_s30  }
  0x33   : > { %s2801_s4 = sld [smem:[#allocation23_spill]] }
  0x39   : > { %s2009_s28 = scalar_lea.hbm %s2801_s4, 512 }
  0x3a   : > { %p2010_p5 = scmp.ne.s32.totalorder %s2801_s4, %s2009_s28  ;;  %p2016_p12 = scmp.lt.u32.totalorder %s2009_s28, %s2801_s4 }
  0x3c   : > { %p2012_p10 = pnand %p2010_p5, %p2389_p8 }
  0x3e   : > { %p2013_p11 = pneg %p2012_p10 }
  0x40   : > { %p2018_p13 = pnand %p2016_p12, %p2013_p11 }
  0x42   : > { %2021 = shalt.err (!%p2018_p13)
}
  0x43   : > { %s2022_s22 = scalar_lea.vmem %s2377_s25, 512  ;;  %p2030_p7 = scmp.lt.s32.totalorder %s2377_s25, %s2377_s25 }
  0x44   : > { %p2023_p0 = scmp.ne.s32.totalorder %s2377_s25, %s2022_s22  ;;  %p2031_p9 = scmp.lt.s32.totalorder %s2022_s22, %s2022_s22 }
  0x46   : > { %p2025_p2 = pnand %p2023_p0, %p2389_p8  ;;  %p2032_p5 = por %p2031_p9, %p2030_p7 }
  0x48   : > { %p2026_p4 = pneg %p2025_p2 }
  0x4a   : > { %p2033_p10 = pnand %p2032_p5, %p2026_p4 }
  0x4c   : > { %2036 = shalt.err (!%p2033_p10)
}
  0x4d   : > { %1874 = dma.hbm_to_vmem [thread:$0]  (!%p2373_p6), %s2801_s4, 512, %s2377_s25, [#allocation9], %s2256_s29, %s2256_s29, %s2257_s30  }
  0x4e   : > { %s2802_s6 = sld [smem:[#allocation24_spill]] }
  0x54   : > { %s2037_s11 = scalar_lea.hbm %s2802_s6, 512 }
  0x55   : > { %p2038_p11 = scmp.ne.s32.totalorder %s2802_s6, %s2037_s11  ;;  %p2044_p0 = scmp.lt.u32.totalorder %s2037_s11, %s2802_s6 }
  0x57   : > { %p2040_p12 = pnand %p2038_p11, %p2389_p8 }
  0x59   : > { %p2041_p13 = pneg %p2040_p12 }
  0x5b   : > { %p2046_p2 = pnand %p2044_p0, %p2041_p13 }
  0x5d   : > { %2049 = shalt.err (!%p2046_p2)
}
  0x5e   : > { %s2050_s22 = scalar_lea.vmem %s343_s27, 512  ;;  %p2058_p5 = scmp.lt.s32.totalorder %s343_s27, %s343_s27 }
  0x5f   : > { %p2051_p4 = scmp.ne.s32.totalorder %s343_s27, %s2050_s22  ;;  %p2059_p10 = scmp.lt.s32.totalorder %s2050_s22, %s2050_s22 }
  0x61   : > { %p2053_p7 = pnand %p2051_p4, %p2389_p8  ;;  %p2060_p1 = por %p2059_p10, %p2058_p5 }
  0x63   : > { %p2054_p9 = pneg %p2053_p7 }
  0x65   : > { %p2061_p3 = pnand %p2060_p1, %p2054_p9 }
  0x67   : > { %2064 = shalt.err (!%p2061_p3)
}
  0x68   : > { %1877 = dma.hbm_to_vmem [thread:$0]  (!%p2373_p6), %s2802_s6, 512, %s343_s27, [#allocation9], %s2256_s29, %s2256_s29, %s2257_s30  }
  0x69   : > { %s2258_s9 = smov [#allocation11]   ;;  %s2803_s8 = sld [smem:[#allocation26_spill]] }
  0x6a   : > { %s358_s10 = sshll.u32 %s2258_s9, 4  ;;  %s359_s10 = int_to_ptr.vmem [resolvable:$true] %s358_s10 }
  0x6f   : > { %s2065_s12 = scalar_lea.hbm %s2803_s8, 512 }
  0x70   : > { %p2066_p1 = scmp.ne.s32.totalorder %s2803_s8, %s2065_s12  ;;  %p2072_p12 = scmp.lt.u32.totalorder %s2065_s12, %s2803_s8 }
  0x72   : > { %p2068_p3 = pnand %p2066_p1, %p2389_p8 }
  0x74   : > { %p2069_p11 = pneg %p2068_p3 }
  0x76   : > { %p2074_p13 = pnand %p2072_p12, %p2069_p11 }
  0x78   : > { %2077 = shalt.err (!%p2074_p13)
}
  0x79   : > { %s2078_s27 = scalar_lea.vmem %s359_s10, 512  ;;  %p2086_p7 = scmp.lt.s32.totalorder %s359_s10, %s359_s10 }
  0x7a   : > { %p2079_p0 = scmp.ne.s32.totalorder %s359_s10, %s2078_s27  ;;  %p2087_p9 = scmp.lt.s32.totalorder %s2078_s27, %s2078_s27 }
  0x7c   : > { %p2081_p2 = pnand %p2079_p0, %p2389_p8  ;;  %p2088_p5 = por %p2087_p9, %p2086_p7 }
  0x7e   : > { %p2082_p4 = pneg %p2081_p2 }
  0x80   : > { %p2089_p10 = pnand %p2088_p5, %p2082_p4 }
  0x82   : > { %2092 = shalt.err (!%p2089_p10)
}
  0x83   : > { %1880 = dma.hbm_to_vmem [thread:$0]  (!%p2373_p6), %s2803_s8, 512, %s359_s10, [#allocation12], %s2256_s29, %s2256_s29, %s2257_s30  }
  0x84   : > { %s1659_s23 = sadd.s32 4294967294, %s2251_s18   ;;  %s43_s21 = sadd.s32 1, %s2247_s17 }
  0x85   : > { %p45_p8 = scmp.ge.s32.totalorder %s43_s21, 2  ;;  %s52_s9 = sadd.s32 1, %s2239_s15 }
  0x86   : > { %p59_p1 = scmp.ne.s32.totalorder %s2239_s15, %s2235_s14  ;;  %p60_p3 = scmp.eq.s32.totalorder %s2251_s18, 0 }
  0x87   : > { %s2833_s21 = smov (%p45_p8, %s43_s21), 0  ;;  %p65_p12 = scmp.ne.s32.totalorder %s2235_s14, %s2231_s13 }
  0x88   : > { %2804 = sst [smem:[#allocation21_spill]] %s2833_s21  ;;  %p2490_p11 = por %p60_p3, %p59_p1 }
  0x89   : > { %s47_s29 = ssub.s32 %s2247_s17, %s2833_s21  ;;  %p285_p6 = scmp.eq.s32.totalorder %s2357_s19, 1 }
  0x8a   : > { %p50_p13 = scmp.eq.s32.totalorder %s47_s29, 0  ;;  %p2806_p0 = scmp.eq.s32.totalorder %s2357_s19, 0 }
  0x8b   : > { %p2505_p4 = por %p285_p6, %p59_p1  ;;  %p291_p7 = scmp.eq.s32.totalorder %s1659_s23, 1 }
  0x8c   : > { %p2501_p2 = por %p2806_p0, %p65_p12  ;;  %p1896_p5 = scmp.lt.s32.totalorder %s2251_s18, 2 }
  0x8d   : > { %s2808_s10 = scalar_select %p2505_p4, 1, 0 }
  0x8e   : > { %s2807_s30 = scalar_select %p2501_p2, 1, 0 }
  0x8f   : > { %s2510_s11 = scalar_select %p50_p13, %s2239_s15, %s52_s9  }
  0x90   : > { %p2512_p9 = por %p291_p7, %p65_p12  ;;  %s375_s24 = sand.u32 1, %s2239_s15  }
  0x91   : > { %s1667_s26 = sshll.u32 %s2247_s17, 7  ;;  %s2519_s28 = sshll.u32 %s375_s24, 3 }
  0x92   : > { %s2809_s12 = scalar_select %p2512_p9, 1, 0 }
  0x93   : > { %s2524_s25 = scalar_lea.hbm %s2772_s0, %s1667_s26  ;;  %s379_s7 = scalar_lea.vmem [#allocation2], %s2519_s28 }
  0x94   : > { %s387_s23 = sshll.u32 %s379_s7, 4  ;;  %p2529_p10 = pnand %p1896_p5, %p2490_p11  ;;  %s2533_s23 = int_to_ptr.vmem [resolvable:$true] %s387_s23 }
  0x95   : > { %s2538_s27 = scalar_lea.hbm %s2773_s1, %s1667_s26  ;;  %s376_s2 = scalar_lea.sflag [#allocation3], %s375_s24 }
  0x96   : > { %s2093_s4 = scalar_lea.hbm %s2524_s25, 128  ;;  %p2095_p1 = pneg %p2529_p10 }
  0x97   : > { %p2094_p8 = scmp.ne.s32.totalorder %s2524_s25, %s2093_s4  ;;  %s2098_s6 = scalar_lea.hbm %s2772_s0, 256 }
  0x98   : > { %p2099_p12 = scmp.lt.u32.totalorder %s2524_s25, %s2772_s0  ;;  %p2100_p6 = scmp.lt.u32.totalorder %s2098_s6, %s2093_s4 }
  0x99   : > { %p2096_p3 = pnand %p2095_p1, %p2094_p8  ;;  %p2102_p0 = scmp.lt.u32.totalorder %s2093_s4, %s2524_s25 }
  0x9a   : > { %p2101_p13 = por %p2100_p6, %p2099_p12 }
  0x9b   : > { %p2097_p11 = pneg %p2096_p3 }
  0x9c   : > { %p2103_p7 = por %p2102_p0, %p2101_p13 }
  0x9e   : > { %p2104_p5 = pnand %p2103_p7, %p2097_p11 }
  0xa0   : > { %2107 = shalt.err (!%p2104_p5)
}
  0xa1   : > { %s2108_s24 = scalar_lea.vmem %s2533_s23, 128  ;;  %s2259_s26 = smov [#allocation2]  }
  0xa2   : > { %p2109_p8 = scmp.ne.s32.totalorder %s2533_s23, %s2108_s24  ;;  %s2113_s29 = sshll.u32 %s2259_s26, 4  ;;  %s2114_s29 = int_to_ptr.vmem [resolvable:$false] %s2113_s29 }
  0xa3   : > { %s2115_s8 = scalar_lea.vmem %s2114_s29, 256  ;;  %p2116_p4 = scmp.lt.s32.totalorder %s2533_s23, %s2114_s29 }
  0xa4   : > { %p2111_p3 = pnand %p2109_p8, %p2095_p1  ;;  %p2117_p12 = scmp.lt.s32.totalorder %s2115_s8, %s2108_s24 }
  0xa6   : > { %p2112_p9 = pneg %p2111_p3  ;;  %p2118_p6 = por %p2117_p12, %p2116_p4 }
  0xa8   : > { %p2119_p13 = pnand %p2118_p6, %p2112_p9 }
  0xaa   : > { %2122 = shalt.err (!%p2119_p13)
}
  0xab   : > { %1884 = dma.hbm_to_vmem [thread:$0]  (!%p2529_p10), %s2524_s25, 128, %s2533_s23, %s376_s2  }
  0xac   : > { %s394_s4 = sand.u32 1, %s2251_s18   ;;  %s398_s6 = scalar_lea.vmem [#allocation5], %s2519_s28 }
  0xad   : > { %s405_s21 = sshll.u32 %s398_s6, 4  ;;  %s395_s22 = scalar_lea.sflag [#allocation6], %s394_s4  ;;  %s406_s21 = int_to_ptr.vmem [resolvable:$true] %s405_s21 }
  0xae   : > { %s2123_s16 = scalar_lea.hbm %s2538_s27, 128  ;;  %s2128_s26 = scalar_lea.hbm %s2773_s1, 256 }
  0xaf   : > { %p2124_p4 = scmp.ne.s32.totalorder %s2538_s27, %s2123_s16  ;;  %p2129_p0 = scmp.lt.u32.totalorder %s2538_s27, %s2773_s1 }
  0xb0   : > { %p2130_p7 = scmp.lt.u32.totalorder %s2128_s26, %s2123_s16  ;;  %p2132_p8 = scmp.lt.u32.totalorder %s2123_s16, %s2538_s27 }
  0xb1   : > { %p2126_p9 = pnand %p2124_p4, %p2095_p1 }
  0xb2   : > { %p2131_p5 = por %p2130_p7, %p2129_p0 }
  0xb3   : > { %p2127_p11 = pneg %p2126_p9 }
  0xb4   : > { %p2133_p3 = por %p2132_p8, %p2131_p5 }
  0xb6   : > { %p2134_p12 = pnand %p2133_p3, %p2127_p11 }
  0xb8   : > { %2137 = shalt.err (!%p2134_p12)
}
  0xb9   : > { %s2138_s2 = scalar_lea.vmem %s406_s21, 128  ;;  %s2260_s28 = smov [#allocation5]  }
  0xba   : > { %p2139_p6 = scmp.ne.s32.totalorder %s406_s21, %s2138_s2  ;;  %s2143_s25 = sshll.u32 %s2260_s28, 4  ;;  %s2144_s25 = int_to_ptr.vmem [resolvable:$false] %s2143_s25 }
  0xbb   : > { %s2145_s23 = scalar_lea.vmem %s2144_s25, 256  ;;  %p2146_p9 = scmp.lt.s32.totalorder %s406_s21, %s2144_s25 }
  0xbc   : > { %p2141_p13 = pnand %p2139_p6, %p2095_p1  ;;  %p2147_p2 = scmp.lt.s32.totalorder %s2145_s23, %s2138_s2 }
  0xbe   : > { %p2142_p4 = pneg %p2141_p13  ;;  %p2148_p0 = por %p2147_p2, %p2146_p9 }
  0xc0   : > { %p2149_p7 = pnand %p2148_p0, %p2142_p4 }
  0xc2   : > { %2152 = shalt.err (!%p2149_p7)
}
  0xc3   : > { %1887 = dma.hbm_to_vmem [thread:$0]  (!%p2529_p10), %s2538_s27, 128, %s406_s21, %s395_s22  }
  0xc4   : > { %p2811_p11 = scmp.ne.s32.totalorder %s2797_s20, 0 }
  0xc5   : > { %s2589_s4 = sand.u32 (!%p2811_p11), 1, %s2235_s14   ;;  %p2812_p2 = scmp.ne.s32.totalorder (!%p2811_p11), %s2807_s30, 0 }
  0xc6   : > { %414 = sbr.rel (%p2811_p11) target bundleno = 2128 (0x850), region = 60  ;;  %s2592_s6 = sshll.u32 (!%p2811_p11), %s2589_s4, 3 }
  0xc7   : > { %s417_s16 = scalar_lea.sflag (!%p2811_p11), [#allocation3], %s2589_s4  ;;  %s420_s7 = scalar_lea.vmem (!%p2811_p11), [#allocation2], %s2592_s6 }
  0xcd   : > { %2206 = dma.done.wait (%p2812_p2), %s417_s16, 128  }
  0xce   : > { %2208 = vsyncadd (%p2812_p2), %s417_s16, 4294967168  ;;  %s425_s20 = sand.u32 1, %s2357_s19   ;;  %s429_s27 = scalar_lea.vmem [#allocation5], %s2592_s6 }
  0xcf   : > { %s426_s9 = scalar_lea.sflag [#allocation6], %s425_s20 }
  0xd0   : > { %2210 = dma.done.wait (%p2812_p2), %s426_s9, 128  }
  0xd1   : > { %2212 = vsyncadd (%p2812_p2), %s426_s9, 4294967168  ;;  %p2813_p10 = scmp.eq.s32.totalorder %s2357_s19, 0 }
  0xd3   : > { %2214 = dma.done.wait (%p2813_p10), [#allocation6], 512   ;;  %p2814_p1 = pmov %p2813_p10 }
  0xd5   : > { %2216 = vsyncadd (%p2814_p1), [#allocation6], 4294966784  ;;  %p2815_p5 = pmov %p2814_p1 }
  0xd6   : > { %p2816_p8 = pmov %p2814_p1 }
  0xd7   : > { %2218 = dma.done.wait (%p2815_p5), [#allocation9], 1024  }
  0xd8   : > { %2220 = vsyncadd (%p2816_p8), [#allocation9], 4294966272  ;;  %p2817_p3 = pmov %p2814_p1 }
  0xd9   : > { %p2818_p12 = pmov %p2814_p1 }
  0xda   : > { %2222 = dma.done.wait (%p2817_p3), [#allocation12], 512  }
  0xdb   : > { %2224 = vsyncadd (%p2818_p12), [#allocation12], 4294966784  ;;  %v2261_v0 = vmov 0.0|0.0   ;;  %vm2262_vm0 = vmmov 0   ;;  %v2263_v1 = vmov 0.0   ;;  %v574_v2 = vld [vmem:[#allocation8] sm:$0xff] }
  0xdc   : > { %1828 = vmatprep.subr.bf16.mxu1 %v2261_v0  ;;  %1822 = vmatprep.subr.bf16.mxu0 %v2261_v0  ;;  %v575_v3 = vld [vmem:[#allocation8 + $0x8] sm:$0xff]  ;;  %v489_v4 = vld [vmem:[#allocation7] sm:$0xff]  ;;  %v576_v7 = vld [vmem:[#allocation8 + $0x10] sm:$0xff]  ;;  %vm500_vm1 = vcmask 261120   ;;  %vm739_vm2 = vcmask 64512   ;;  %s2264_s24 = smov 120  }
  0xdd   : > { %1757 = vmatprep.mubr.msk.f32.mxu1 %vm2262_vm0, %v2263_v1  ;;  %1746 = vmatprep.mubr.msk.f32.mxu0 %vm2262_vm0, %v2263_v1  ;;  %v1829_v5 = vpack.c.bf16 %v575_v3, %v574_v2  ;;  %v490_v6 = vld [vmem:[#allocation7 + $0x8] sm:$0xff]  ;;  %v577_v8 = vld [vmem:[#allocation8 + $0x18] sm:$0xff]  ;;  %v491_v10 = vld [vmem:[#allocation7 + $0x10] sm:$0xff]  ;;  %s2265_s26 = smov 112   ;;  %s2266_s29 = smov 104   ;;  %vm1413_vm3 = vcmask 130048  }
  0xde   : > { %v1823_v9 = vpack.c.bf16 %v490_v6, %v489_v4  ;;  %v492_v11 = vld [vmem:[#allocation7 + $0x18] sm:$0xff]  ;;  %v1832_v12 = vpack.c.bf16 %v577_v8, %v576_v7  ;;  %v487_v15 = vld [vmem:[%s420_s7] sm:$0xff]  ;;  %v660_v26 = vld [vmem:[#allocation10 + $0x10] sm:$0xff]  ;;  %s2819_s28 = sld [smem:[#allocation25_spill]]  ;;  %s2267_s25 = smov 8   ;;  %vm1415_vm4 = vcmask 195584  }
  0xdf   : > { %1830 = vmatpush3.bf16.msra.mxu1 %v1829_v5  ;;  %v1826_v13 = vpack.c.bf16 %v492_v11, %v491_v10  ;;  %v488_v14 = vld [vmem:[%s429_s27] sm:$0xff]  ;;  %v1680_v16 = vld [vmem:[%s2777_s5] ss:$0 sm:$0xff]  ;;  %v659_v25 = vld [vmem:[#allocation10 + $0x8] sm:$0xff]  ;;  %s2268_s23 = smov 16   ;;  %s2820_s16 = sld [smem:[#allocation20_spill]] }
  0xe0   : > { %1824 = vmatpush3.bf16.msra.mxu0 %v1823_v9  ;;  %1831 = vmatprep.subr.bf16.mxu1 %v2261_v0  ;;  %v1678_v17 = vld [vmem:[%s2775_s3] ss:$0 sm:$0xff]  ;;  %v661_v28 = vld [vmem:[#allocation10 + $0x18] sm:$0xff]  ;;  %s2269_s7 = smov 24   ;;  %s2821_s27 = sld [smem:[#allocation27_spill]] }
  0xe1   : > { %1825 = vmatprep.subr.bf16.mxu0 %v2261_v0  ;;  %v658_v24 = vld [vmem:[#allocation10] sm:$0xff]  ;;  %v1838_v29 = vpack.c.bf16 %v661_v28, %v660_v26  ;;  %s486_s30 = scalar_lea.vmem [#allocation13], %s2592_s6  ;;  %s1503_s8 = scalar_lea.sflag [#allocation4], %s2589_s4 }
  0xe2   : > { %v1835_v27 = vpack.c.bf16 %v659_v25, %v658_v24  ;;  %s1517_s21 = sshll.u32 %s486_s30, 4  ;;  %p2823_p13 = scmp.ne.s32.totalorder %s2808_s10, 0  ;;  %s2724_s21 = int_to_ptr.vmem [resolvable:$true] %s1517_s21 }
  0xe3   : > { %1833 = vmatpush3.bf16.msra.mxu1 %v1832_v12  ;;  %s2153_s2 = scalar_lea.vmem %s2724_s21, 128  ;;  %s2270_s6 = smov [#allocation13]  }
  0xe4   : > { %1827 = vmatpush3.bf16.msra.mxu0 %v1826_v13  ;;  %1771 = vmatprep.subr.mxu1 %v2263_v1  ;;  %v1682_v39 = vld [vmem:[%s2819_s28] ss:$0 sm:$0xff]  ;;  %p2154_p6 = scmp.ne.s32.totalorder %s2724_s21, %s2153_s2  ;;  %s2157_s28 = sshll.u32 %s2270_s6, 4  ;;  %s2158_s28 = int_to_ptr.vmem [resolvable:$false] %s2157_s28 }
  0xe5   : > { %1834 = vmatprep.subr.bf16.mxu0 %v2261_v0  ;;  %s1699_s19 = sshll.u32 %s2820_s16, 7  ;;  %p2160_p0 = scmp.lt.s32.totalorder %s2724_s21, %s2158_s28 }
  0xe6   : > { %1758 = vmatmul.mubr.msk.f32.vlgmr.msra.gmra.mrb[0].mxu1 %vm500_vm1, %v488_v14  ;;  %p2155_p4 = pnand %p2154_p6, %p2823_p13 }
  0xe7   : > { %1747 = vmatmul.mubr.msk.f32.vlgmr.msra.gmra.mrb[0].mxu0 %vm500_vm1, %v487_v15  ;;  %1773 = vmatprep.mubr.msk.f32.mxu1 %vm2262_vm0, %v2263_v1 }
  0xe8   : > { %1768 = vmatprep.mubr.msk.f32.mxu0 %vm2262_vm0, %v2263_v1  ;;  %1836 = vmatpush3.bf16.msra.mxu0 %v1835_v27  ;;  %p2156_p9 = pneg %p2155_p4 }
  0xe9   : > { %1837 = vmatprep.subr.bf16.mxu0 %v2261_v0 }
  0xec   : > { %1839 = vmatpush3.bf16.msra.mxu0 %v1838_v29 }
  0xed   : > { %1791 = vmatprep.subr.mxu0 %v2263_v1 }
  0xef   : > { %1769 = vmatmul.mubr.msk.f32.vlgmr.msra.gmra.mrb[2].mxu0 %vm500_vm1, %v488_v14 }
  0xf0   : > { %1793 = vmatprep.mubr.msk.f32.mxu0 %vm2262_vm0, %v2263_v1 }
 0x1b9   : > { %v654_v18 = vpop.f32.mrb[0].mxu1 }
 0x1ba   : > { %v655_v19 = vadd.f32 %v1680_v16, %v654_v18  ;;  %v1759_v20 = vpop.f32.mrb[1].mxu1  ;;  %v570_v21 = vpop.f32.mrb[0].mxu0 }
 0x1bb   : > { %v571_v22 = vadd.f32 %v1678_v17, %v570_v21  ;;  %v1748_v23 = vpop.f32.mrb[1].mxu0 }
 0x1bc   : > { %903 = vrot.lane.b32.xlu1 %v655_v19, %s2264_s24  ;;  %1772 = vmatpush3.xpose.msk.msra.mxu1 %vm739_vm2, %v655_v19 }
 0x1bd   : > { %1776 = vmatprep.subr.mxu1 %v2263_v1 }
 0x1bf   : > { %1774 = vmatmul.mubr.msk.f32.vlgmr.msra.gmra.mrb[2].mxu1 %vm739_vm2, %v571_v22 }
 0x1c0   : > { %901 = vrot.lane.b32.xlu1 %v571_v22, %s2264_s24  ;;  %1778 = vmatprep.mubr.msk.f32.mxu1 %vm2262_vm0, %v2263_v1 }
 0x1c2   : > { %v735_v40 = vpop.f32.mrb[2].mxu0 }
 0x1c3   : > { %v2664_v41 = vadd.f32 %v1682_v39, %v735_v40  ;;  %v1770_v42 = vpop.f32.mrb[3].mxu0 }
 0x1c4   : > { %1068 = vrot.lane.b32.xlu1 %v571_v22, %s2265_s26 }
 0x1c5   : > { %1777 = vmatpush3.msra.mxu1 %v2664_v41 }
 0x1c6   : > { %1781 = vmatprep.subr.mxu1 %v2263_v1 }
 0x1c8   : > { %1236 = vrot.lane.b32.xlu1 %v655_v19, %s2266_s29 }
 0x1cc   : > { %1234 = vrot.lane.b32.xlu1 %v571_v22, %s2266_s29 }
 0x22e   : > { %v904_v43 = vpop.permute.xlu1 %903 }
 0x232   : > { %v902_v44 = vpop.permute.xlu1 %901 }
 0x236   : > { %v1069_v45 = vpop.permute.xlu1 %1068 }
 0x23a   : > { %v1237_v48 = vpop.permute.xlu1 %1236 }
 0x23e   : > { %v1235_v50 = vpop.permute.xlu1 %1234 }
 0x292   : > { %v812_v30 = vpop.f32.mrb[2].mxu1 }
 0x293   : > { %v816_v31 = vmul.f32 0.35355338, %v812_v30  ;;  %v1775_v32 = vpop.f32.mrb[3].mxu1 }
 0x294   : > { %v1418_v32 = vld [vmem:[#allocation11 + $0x8] sm:$0xff] }
 0x295   : > { %v817_v33 = vsel %vm739_vm2, %v816_v31, -inf }
 0x296   : > { %818 = vmax.xlane.f32.xlu0 %v817_v33 }
 0x323   : > { %v819_v34 = vpop.xlane.xlu0 %818 }
 0x324   : > { %v820_v35 = vsub.f32 %v816_v31, %v819_v34  ;;  %v1417_v31 = vld [vmem:[#allocation11] sm:$0xff]  ;;  %v1419_v34 = vld [vmem:[#allocation11 + $0x10] sm:$0xff] }
 0x325   : > { %v1841_v33 = vpack.c.bf16 %v1418_v32, %v1417_v31 }
 0x326   : > { %v821_v36 = vmul.f32 1.442695, %v820_v35  ;;  %v1420_v35 = vld [vmem:[#allocation11 + $0x18] sm:$0xff] }
 0x328   : > { %1965 = vpow2.f32 %v821_v36  ;;  %v1844_v36 = vpack.c.bf16 %v1420_v35, %v1419_v34 }
 0x332   : > { %v1966_v37 = vpop.eup %1965 }
 0x333   : > { %v823_v38 = vsel %vm739_vm2, %v1966_v37, 0.0 }
 0x334   : > { %824 = vadd.xlane.f32.xlu0 %v823_v38 }
 0x34a   : > { %1070 = vrot.lane.b32.xlu0 %v655_v19, %s2265_s26 }
 0x3c1   : > { %v825_v46 = vpop.xlane.xlu0 %824 }
 0x3c2   : > { %1967 = vrcp.f32 %v825_v46 }
 0x3c5   : > { %v1071_v47 = vpop.permute.xlu0 %1070 }
 0x3c6   : > { %1792 = vmatpush3.xpose.msk.msra.mxu0 %vm739_vm2, %v1071_v47  ;;  %v1696_v47 = vld [vmem:[%s2821_s27] ss:$0 sm:$0xff] }
 0x3c7   : > { %1801 = vmatprep.subr.mxu0 %v2263_v1 }
 0x3c9   : > { %1794 = vmatmul.mubr.msk.f32.vlgmr.msra.gmra.mrb[4].mxu0 %vm739_vm2, %v1069_v45 }
 0x3ca   : > { %1802 = vmatpush3.xpose.msk.msra.mxu0 %vm739_vm2, %v1237_v48  ;;  %1803 = vmatprep.mubr.msk.f32.mxu0 %vm2262_vm0, %v2263_v1 }
 0x3cb   : > { %1840 = vmatprep.subr.bf16.mxu0 %v2261_v0 }
 0x3cc   : > { %v1968_v49 = vpop.eup %1967 }
 0x3cd   : > { %v827_v51 = vmul.f32 %v1968_v49, %v1966_v37  ;;  %1804 = vmatmul.mubr.msk.f32.vlgmr.msra.gmra.mrb[6].mxu0 %vm739_vm2, %v1235_v50 }
 0x3ce   : > { %1819 = vmatprep.mubr.msk.f32.mxu0 %vm2262_vm0, %v2263_v1  ;;  %1842 = vmatpush3.bf16.msra.mxu0 %v1841_v33 }
 0x3cf   : > { %1779 = vmatmul.mubr.msk.f32.vlgmr.msra.gmra.mrb[4].mxu1 %vm739_vm2, %v827_v51  ;;  %1843 = vmatprep.subr.bf16.mxu0 %v2261_v0 }
 0x3d0   : > { %1782 = vmatpush3.xpose.msk.msra.mxu1 %vm739_vm2, %v904_v43  ;;  %1783 = vmatprep.mubr.msk.f32.mxu1 %vm2262_vm0, %v2263_v1 }
 0x3d1   : > { %1786 = vmatprep.subr.mxu1 %v2263_v1 }
 0x3d2   : > { %1845 = vmatpush3.bf16.msra.mxu0 %v1844_v36 }
 0x3d3   : > { %1784 = vmatmul.mubr.msk.f32.vlgmr.msra.gmra.mrb[6].mxu1 %vm739_vm2, %v902_v44 }
 0x3d4   : > { %1788 = vmatprep.mubr.msk.f32.mxu1 %vm2262_vm0, %v2263_v1 }
 0x49c   : > { %v1142_v52 = vpop.f32.mrb[4].mxu0 }
 0x49d   : > { %v1146_v53 = vmul.f32 0.35355338, %v1142_v52  ;;  %v1795_v54 = vpop.f32.mrb[5].mxu0 }
 0x49f   : > { %v1147_v55 = vsel %vm739_vm2, %v1146_v53, -inf }
 0x4a0   : > { %1148 = vmax.xlane.f32.xlu0 %v1147_v55  ;;  %v1308_v56 = vpop.f32.mrb[6].mxu0 }
 0x4a1   : > { %v1805_v57 = vpop.f32.mrb[7].mxu0  ;;  %v1312_v63 = vmul.f32 0.35355338, %v1308_v56 }
 0x4a2   : > { %v2688_v58 = vpop.f32.mrb[4].mxu1 }
 0x4a3   : > { %v1780_v59 = vpop.f32.mrb[5].mxu1  ;;  %v1313_v3 = vsel %vm739_vm2, %v1312_v63, -inf }
 0x4a6   : > { %v975_v60 = vpop.f32.mrb[6].mxu1 }
 0x4a7   : > { %v979_v61 = vmul.f32 0.35355338, %v975_v60  ;;  %v1785_v62 = vpop.f32.mrb[7].mxu1 }
 0x4a9   : > { %v980_v2 = vsel %vm739_vm2, %v979_v61, -inf }
 0x4aa   : > { %981 = vmax.xlane.f32.xlu1 %v980_v2 }
 0x4ae   : > { %1314 = vmax.xlane.f32.xlu1 %v1313_v3 }
 0x52d   : > { %v1149_v4 = vpop.xlane.xlu0 %1148 }
 0x52e   : > { %v1150_v5 = vsub.f32 %v1146_v53, %v1149_v4 }
 0x530   : > { %v1151_v6 = vmul.f32 1.442695, %v1150_v5 }
 0x532   : > { %1969 = vpow2.f32 %v1151_v6 }
 0x537   : > { %v982_v7 = vpop.xlane.xlu1 %981 }
 0x538   : > { %v983_v15 = vsub.f32 %v979_v61, %v982_v7 }
 0x53a   : > { %v984_v16 = vmul.f32 1.442695, %v983_v15 }
 0x53b   : > { %v1315_v8 = vpop.xlane.xlu1 %1314 }
 0x53c   : > { %v1970_v9 = vpop.eup %1969  ;;  %v1316_v10 = vsub.f32 %v1312_v63, %v1315_v8 }
 0x53d   : > { %v1153_v11 = vsel %vm739_vm2, %v1970_v9, 0.0 }
 0x53e   : > { %v1317_v12 = vmul.f32 1.442695, %v1316_v10  ;;  %1154 = vadd.xlane.f32.xlu0 %v1153_v11 }
 0x540   : > { %1971 = vpow2.f32 %v1317_v12 }
 0x541   : > { %1973 = vpow2.f32 %v984_v16 }
 0x54a   : > { %v1972_v13 = vpop.eup %1971 }
 0x54b   : > { %v1319_v14 = vsel %vm739_vm2, %v1972_v13, 0.0  ;;  %v1974_v17 = vpop.eup %1973 }
 0x54c   : > { %1320 = vadd.xlane.f32.xlu1 %v1319_v14  ;;  %v986_v18 = vsel %vm739_vm2, %v1974_v17, 0.0 }
 0x554   : > { %992 = vrot.lane.b32.xlu0 %v2664_v41, %s2264_s24 }
 0x55d   : > { %1158 = vrot.lane.b32.xlu1 %v2664_v41, %s2265_s26  ;;  %s2822_s26 = sld [smem:[#allocation28_spill]] }
 0x581   : > { %987 = vadd.xlane.f32.xlu1 %v986_v18 }
 0x592   : > { %1324 = vrot.lane.b32.xlu1 %v2664_v41, %s2266_s29  ;;  %s2722_s29 = scalar_lea.hbm %s2822_s26, %s1699_s19 }
 0x5cb   : > { %v1155_v19 = vpop.xlane.xlu0 %1154 }
 0x5cf   : > { %v993_v20 = vpop.permute.xlu0 %992 }
 0x5d0   : > { %1787 = vmatpush3.msra.mxu1 %v993_v20 }
 0x5d1   : > { %1796 = vmatprep.subr.mxu1 %v2263_v1 }
 0x5d9   : > { %v1321_v21 = vpop.xlane.xlu1 %1320 }
 0x5dd   : > { %v1159_v22 = vpop.permute.xlu1 %1158 }
 0x60e   : > { %v988_v23 = vpop.xlane.xlu1 %987 }
 0x60f   : > { %1975 = vrcp.f32 %v988_v23 }
 0x610   : > { %1977 = vrcp.f32 %v1155_v19 }
 0x611   : > { %1979 = vrcp.f32 %v1321_v21 }
 0x612   : > { %v1325_v29 = vpop.permute.xlu1 %1324 }
 0x619   : > { %v1976_v24 = vpop.eup %1975 }
 0x61a   : > { %v990_v25 = vmul.f32 %v1976_v24, %v1974_v17  ;;  %v1978_v26 = vpop.eup %1977 }
 0x61b   : > { %v1157_v27 = vmul.f32 %v1978_v26, %v1970_v9  ;;  %v1980_v28 = vpop.eup %1979 }
 0x61c   : > { %1789 = vmatmul.mubr.msk.f32.vlgmr.msra.gmra.mrb[8].mxu1 %vm739_vm2, %v990_v25  ;;  %v1323_v30 = vmul.f32 %v1980_v28, %v1972_v13 }
 0x61d   : > { %1797 = vmatpush3.msra.mxu1 %v1159_v22  ;;  %1798 = vmatprep.mubr.msk.f32.mxu1 %vm2262_vm0, %v2263_v1 }
 0x61e   : > { %1806 = vmatprep.subr.mxu1 %v2263_v1 }
 0x620   : > { %1799 = vmatmul.mubr.msk.f32.vlgmr.msra.gmra.mrb[10].mxu1 %vm739_vm2, %v1157_v27 }
 0x621   : > { %1807 = vmatpush3.msra.mxu1 %v1325_v29  ;;  %1808 = vmatprep.mubr.msk.f32.mxu1 %vm2262_vm0, %v2263_v1 }
 0x624   : > { %1809 = vmatmul.mubr.msk.f32.vlgmr.msra.gmra.mrb[12].mxu1 %vm739_vm2, %v1323_v30 }
 0x6ef   : > { %v1064_v37 = vpop.f32.mrb[8].mxu1 }
 0x6f0   : > { %1401 = vrot.lane.b32.xlu0 %v1064_v37, %s2267_s25  ;;  %v1790_v38 = vpop.f32.mrb[9].mxu1  ;;  %s2159_s25 = scalar_lea.vmem %s2158_s28, 256 }
 0x6f1   : > { %p2161_p7 = scmp.lt.s32.totalorder %s2159_s25, %s2153_s2 }
 0x6f3   : > { %v1230_v39 = vpop.f32.mrb[10].mxu1  ;;  %p2162_p11 = por %p2161_p7, %p2160_p0 }
 0x6f4   : > { %1405 = vrot.lane.b32.xlu1 %v1230_v39, %s2268_s23  ;;  %v1800_v1 = vpop.f32.mrb[11].mxu1 }
 0x6f5   : > { %p2163_p2 = pnand %p2162_p11, %p2156_p9 }
 0x6f7   : > { %v1396_v40 = vpop.f32.mrb[12].mxu1 }
 0x6f8   : > { %1409 = vrot.lane.b32.xlu0 %v1396_v40, %s2269_s7  ;;  %v1810_v41 = vpop.f32.mrb[13].mxu1 }
 0x762   : > { %v1402_v42 = vpop.permute.xlu0 %1401 }
 0x763   : > { %v1412_v43 = vsel %vm739_vm2, %v2688_v58, %v1402_v42 }
 0x766   : > { %v1406_v0 = vpop.permute.xlu1 %1405 }
 0x767   : > { %v1414_v44 = vsel %vm1413_vm3, %v1412_v43, %v1406_v0 }
 0x76a   : > { %v1410_v45 = vpop.permute.xlu0 %1409 }
 0x76b   : > { %v1416_v46 = vsel %vm1415_vm4, %v1414_v44, %v1410_v45 }
 0x76c   : > { %1820 = vmatmul.mubr.msk.f32.vlgmr.msra.gmra.mrb[8].mxu0 %vm500_vm1, %v1416_v46 }
 0x83f   : > { %v1497_v48 = vpop.f32.mrb[8].mxu0 }
 0x840   : > { %v1498_v49 = vadd.f32 %v1696_v47, %v1497_v48  ;;  %v1821_v50 = vpop.f32.mrb[9].mxu0 }
 0x842   : > { %1501 = vst.msk [vmem:[%s486_s30] sm:$0xff] %vm500_vm1, %v1498_v49 }
 0x843   : > { %2166 = shalt.err (!%p2163_p2)
}
 0x844   : > { %s2167_s4 = scalar_lea.hbm %s2722_s29, 128  ;;  %s2171_s7 = scalar_lea.hbm %s2822_s26, 256 }
 0x845   : > { %p2168_p10 = scmp.ne.s32.totalorder %s2722_s29, %s2167_s4  ;;  %p2172_p8 = scmp.lt.u32.totalorder %s2722_s29, %s2822_s26 }
 0x846   : > { %p2173_p3 = scmp.lt.u32.totalorder %s2171_s7, %s2167_s4  ;;  %p2175_p6 = scmp.lt.u32.totalorder %s2167_s4, %s2722_s29 }
 0x847   : > { %p2169_p1 = pnand %p2168_p10, %p2823_p13 }
 0x848   : > { %p2174_p12 = por %p2173_p3, %p2172_p8 }
 0x849   : > { %p2170_p5 = pneg %p2169_p1 }
 0x84a   : > { %p2176_p4 = por %p2175_p6, %p2174_p12 }
 0x84c   : > { %p2177_p9 = pnand %p2176_p4, %p2170_p5 }
 0x84e   : > { %2180 = shalt.err (!%p2177_p9)
}
 0x84f   : > { %1866 = dma.vmem_to_hbm [thread:$0]  (%p2823_p13), %s2724_s21, 128, %s2722_s29, %s1503_s8  }
 0x850 PF: > { %s1529_s27 = sand.u32 1, %s2231_s13   ;;  %p2824_p0 = scmp.ne.s32.totalorder %s2809_s12, 0 }
 0x851   : > { %p2825_p7 = scmp.ge.s32.totalorder %s2251_s18, 2  ;;  %s1530_s19 = scalar_lea.sflag [#allocation4], %s1529_s27 }
 0x853   : > { %p1889_p11 = pnand %p2825_p7, %p2824_p0 }
 0x855   : > { %2226 = dma.done.wait (!%p1889_p11), %s1530_s19, 128  }
 0x856   : > { %2228 = vsyncadd (!%p1889_p11), %s1530_s19, 4294967168  ;;  %s31_s18 = sadd.s32 1, %s2251_s18   ;;  %s2826_s10 = sld [smem:[#allocation21_spill]] }
 0x857   : > { %p28_p2 = scmp.ge.s32.totalorder %s31_s18, 4   ;;  %s2827_s13 = smov %s2235_s14 }
 0x858   : > { %s2828_s14 = smov %s2239_s15  ;;  %s2829_s15 = smov %s2510_s11 }
 0x859   : > { %s2830_s16 = smov %s2247_s17  ;;  %30 = sbr.rel (!%p28_p2) target bundleno = 18 (0x12), region = 134 }
 0x85c   : > { %s2831_s17 = smov %s2826_s10 }
 0x860   :  { %1535 = vsyncpa [#allocation3], 1 }
 0x861   :  { %1537 = vsyncpa [#allocation3 + $0x1], 1 }
 0x862   :  { %1538 = vsyncpa [#allocation6], 1 }
 0x863   :  { %1540 = vsyncpa [#allocation6 + $0x1], 1 }
 0x864   :  { %1541 = vsyncpa [#allocation9], 1 }
 0x865   :  { %1542 = vsyncpa [#allocation12], 1 }
 0x866   :  { %1543 = vsyncpa [#allocation4], 1 }
 0x867   :  { %1545 = vsyncpa [#allocation4 + $0x1], 1 }

</bundles_post_ra>
